<compile_context>
chip_gen: v6e
topology: v6e:2x2x1
jax: 0.10.0
libtpu: 0.0.40
codegen_flags: <defaults>
</compile_context>

<pallas_src>
import functools
import math

import jax
import jax.numpy as jnp
from jax.experimental import pallas as pl
from jax.experimental.pallas import tpu as pltpu


# --------------------------------------------------------------------------
# Fused kernel: patch-embed GEMM -> 1x1 proj GEMM -> GroupNorm, per sample,
# tiled over the flattened spatial axis.
#   grid = (N, num_row_tiles);  batch axis "parallel", row axis "arbitrary".
#   Scratch: ybuf holds the projected activations of the current sample
#   (HW, Cout) f32; s1/s2 accumulate per-channel sums for the group stats.
# --------------------------------------------------------------------------
def _fused_backbone_proj_gn_kernel(
        x_ref, wb_ref, wp_ref, bf_ref, gmap_ref, gmapt_ref,
        gamma_ref, beta_ref, o_ref, ybuf_ref, s1_ref, s2_ref,
        *, eps, row_tile):
    t = pl.program_id(1)
    nt = pl.num_programs(1)

    @pl.when(t == 0)
    def _():
        s1_ref[...] = jnp.zeros_like(s1_ref)
        s2_ref[...] = jnp.zeros_like(s2_ref)

    # Fused GEMMs on the MXU: bf16 operands, f32 accumulation.  The
    # (row_tile, Cb) intermediate stays in VMEM / vregs only.
    x = x_ref[0]                                                    # (T, K) bf16
    feats = jnp.dot(x, wb_ref[...],
                    preferred_element_type=jnp.float32)             # (T, Cb) f32
    y = jnp.dot(feats.astype(wp_ref.dtype), wp_ref[...],
                preferred_element_type=jnp.float32) + bf_ref[...]   # (T, Cout) f32

    off = pl.multiple_of(t * row_tile, row_tile)
    ybuf_ref[pl.ds(off, row_tile), :] = y

    # GroupNorm statistics accumulated in f32 (single-pass sum / sum-of-sq).
    s1_ref[...] += jnp.sum(y, axis=0, keepdims=True)
    s2_ref[...] += jnp.sum(y * y, axis=0, keepdims=True)

    @pl.when(t == nt - 1)
    def _():
        # Merged group-stat matmuls: (2,Cout)@(Cout,G) then (2,G)@(G,Cout);
        # 1/denom is already folded into gmapt by the wrapper.
        s12 = jnp.concatenate([s1_ref[...], s2_ref[...]], axis=0)   # (2, Cout)
        g12 = jnp.dot(s12, gmap_ref[...], preferred_element_type=jnp.float32)
        c12 = jnp.dot(g12, gmapt_ref[...], preferred_element_type=jnp.float32)
        mean_c = c12[0:1, :]                                        # (1, Cout)
        var_c = c12[1:2, :] - mean_c * mean_c
        inv_std = jax.lax.rsqrt(var_c + eps)
        scale = gamma_ref[...] * inv_std
        shift = beta_ref[...] - mean_c * scale

        y_hat = ybuf_ref[...] * scale + shift                       # (HW, Cout)
        # Emit channels-first so the wrapper does no NHWC->NCHW transpose and
        # the store is lane-dense along the (large) spatial axis.
        o_ref[0] = jnp.transpose(y_hat).astype(o_ref.dtype)         # (Cout, HW)


def _pick_row_tile(hw, target=512):
    if hw <= target:
        return hw
    for t in range(target, 7, -8):
        if hw % t == 0:
            return t
    return hw  # fall back to a single block


# --------------------------------------------------------------------------
# Glue: im2col, mask downsample, sinusoidal position embedding (DETR-style).
# --------------------------------------------------------------------------
def im2col_patches(x_nchw, patch):
    N, C, H, W = x_nchw.shape
    Hf, Wf = H // patch, W // patch
    x = x_nchw.reshape(N, C, Hf, patch, Wf, patch)
    x = x.transpose(0, 2, 4, 1, 3, 5)              # (N, Hf, Wf, C, p, p)
    return x.reshape(N, Hf * Wf, C * patch * patch), (N, Hf, Wf)


def position_embedding_sine(mask, num_pos_feats, temperature=10000.0):
    # TODO(synk): sine pos-embed (cumsum + sin/cos) kept in plain JAX glue.
    scale = 2.0 * math.pi
    not_mask = (~mask).astype(jnp.float32)         # (N, Hf, Wf)
    y_embed = jnp.cumsum(not_mask, axis=1)
    x_embed = jnp.cumsum(not_mask, axis=2)
    eps = 1e-6
    y_embed = y_embed / (y_embed[:, -1:, :] + eps) * scale
    x_embed = x_embed / (x_embed[:, :, -1:] + eps) * scale

    dim_t = jnp.arange(num_pos_feats, dtype=jnp.float32)
    dim_t = temperature ** (2.0 * jnp.floor(dim_t / 2.0) / num_pos_feats)

    pos_x = x_embed[..., None] / dim_t             # (N, Hf, Wf, npf)
    pos_y = y_embed[..., None] / dim_t
    N, Hf, Wf, _ = pos_x.shape
    pos_x = jnp.stack([jnp.sin(pos_x[..., 0::2]), jnp.cos(pos_x[..., 1::2])],
                      axis=4).reshape(N, Hf, Wf, -1)
    pos_y = jnp.stack([jnp.sin(pos_y[..., 0::2]), jnp.cos(pos_y[..., 1::2])],
                      axis=4).reshape(N, Hf, Wf, -1)
    pos = jnp.concatenate([pos_y, pos_x], axis=3).transpose(0, 3, 1, 2)
    return pos                                     # (N, 2*npf, Hf, Wf) NCHW


def dino_backbone_forward(x_nchw, mask, params, patch=4, num_groups=8,
                          eps=1e-5):
    # backbone -> (features, poss); take last level, decompose, project.
    patches, (N, Hf, Wf) = im2col_patches(x_nchw, patch)   # (N, HW, K)
    HW = Hf * Wf
    K = patches.shape[-1]
    Cb = params["w_back"].shape[1]
    Cout = params["w_proj"].shape[1]
    assert Cout % num_groups == 0, "GroupNorm requires Cout % num_groups == 0"
    Cg = Cout // num_groups
    denom = float(HW * Cg)

    row_tile = _pick_row_tile(HW)
    nt = HW // row_tile

    # One-hot channel->group map (contiguous channel blocks, as nn.GroupNorm);
    # 1/denom folded into the broadcast-back map to save per-channel divides.
    gmap = (jnp.arange(Cout)[:, None] // Cg
            == jnp.arange(num_groups)[None, :]).astype(jnp.float32)   # (Cout,G)
    gmapt = gmap.T / denom                                             # (G,Cout)

    patches_bf16 = patches.astype(jnp.bfloat16)
    wb = params["w_back"].astype(jnp.bfloat16)
    wp = params["w_proj"].astype(jnp.bfloat16)
    # Fold backbone bias through the 1x1 projection:  (x@wb+bb)@wp+bp
    #   = x@wb@wp + (bb@wp + bp).  Computed once in f32 in the wrapper.
    b_fused = (jnp.dot(params["b_back"].astype(jnp.float32),
                       params["w_proj"].astype(jnp.float32))
               + params["b_proj"].astype(jnp.float32)).reshape(1, Cout)
    gamma = params["gamma"].reshape(1, Cout).astype(jnp.float32)
    beta = params["beta"].reshape(1, Cout).astype(jnp.float32)

    kernel = functools.partial(_fused_backbone_proj_gn_kernel,
                               eps=eps, row_tile=row_tile)
    cost = pl.CostEstimate(
        flops=2 * N * HW * (K * Cb + Cb * Cout),
        transcendentals=N * Cout,
        bytes_accessed=(N * HW * K * 2 + N * Cout * HW * 4
                        + (K * Cb + Cb * Cout) * 2),
    )

    proj_nchw_flat = pl.pallas_call(
        kernel,
        out_shape=jax.ShapeDtypeStruct((N, Cout, HW), jnp.float32),
        grid=(N, nt),
        in_specs=[
            pl.BlockSpec((1, row_tile, K), lambda n, t: (n, t, 0)),
            pl.BlockSpec((K, Cb), lambda n, t: (0, 0)),
            pl.BlockSpec((Cb, Cout), lambda n, t: (0, 0)),
            pl.BlockSpec((1, Cout), lambda n, t: (0, 0)),
            pl.BlockSpec((Cout, num_groups), lambda n, t: (0, 0)),
            pl.BlockSpec((num_groups, Cout), lambda n, t: (0, 0)),
            pl.BlockSpec((1, Cout), lambda n, t: (0, 0)),
            pl.BlockSpec((1, Cout), lambda n, t: (0, 0)),
        ],
        out_specs=pl.BlockSpec((1, Cout, HW), lambda n, t: (n, 0, 0)),
        scratch_shapes=[
            pltpu.VMEM((HW, Cout), jnp.float32),   # buffered projected acts
            pltpu.VMEM((1, Cout), jnp.float32),    # sum
            pltpu.VMEM((1, Cout), jnp.float32),    # sum of squares
        ],
        compiler_params=pltpu.CompilerParams(
            dimension_semantics=("parallel", "arbitrary"),
            vmem_limit_bytes=48 * 1024 * 1024),
        cost_estimate=cost,
    )(patches_bf16, wb, wp, b_fused, gmap, gmapt, gamma, beta)

    src_proj = proj_nchw_flat.reshape(N, Cout, Hf, Wf)     # NCHW, free reshape

    # NestedTensor padding mask downsampled to feature resolution (nearest).
    mask_ds = mask[:, ::patch, ::patch]

    pos = position_embedding_sine(mask_ds, num_pos_feats=Cout // 2)
    poss = [pos]
    return src_proj, mask_ds, poss


if __name__ == "__main__":
    key = jax.random.PRNGKey(0)
    N, Cin, H, W = 2, 3, 16, 16
    patch = 4
    Cb = 16        # synthetic backbone channels
    hidden = 32    # input_proj hidden_dim
    num_groups = 8

    k1, k2, k3, k4, k5 = jax.random.split(key, 5)
    x = jax.random.normal(k1, (N, Cin, H, W), jnp.float32)    # NCHW like torch
    # NestedTensor padding mask (True = padded); pad right half of sample 1.
    mask = jnp.zeros((N, H, W), dtype=bool).at[1, :, W // 2:].set(True)

    K = Cin * patch * patch
    params = dict(
        w_back=jax.random.normal(k2, (K, Cb), jnp.float32) * 0.05,
        b_back=jax.random.normal(k3, (Cb,), jnp.float32) * 0.05,
        w_proj=jax.random.normal(k4, (Cb, hidden), jnp.float32) * 0.05,
        b_proj=jax.random.normal(k5, (hidden,), jnp.float32) * 0.05,
        gamma=jnp.ones((hidden,), jnp.float32),
        beta=jnp.zeros((hidden,), jnp.float32),
    )

    src_proj, mask_out, poss = dino_backbone_forward(
        x, mask, params, patch=patch, num_groups=num_groups)
    jax.block_until_ready((src_proj, mask_out, poss))

    assert src_proj.shape == (N, hidden, H // patch, W // patch)
    assert mask_out.shape == (N, H // patch, W // patch)
    assert poss[0].shape == (N, hidden, H // patch, W // patch)
    assert bool(jnp.all(jnp.isfinite(src_proj)))
    print("KERNEL_OK")
</pallas_src>

<mosaic_0001>
module attributes {stable_mosaic.version = 11 : i64} {
  func.func @_fused_backbone_proj_gn_kernel(%arg0: i32, %arg1: i32, %arg2: memref<1x16x48xbf16, #tpu.memory_space<vmem>>, %arg3: memref<48x16xbf16, #tpu.memory_space<vmem>>, %arg4: memref<16x32xbf16, #tpu.memory_space<vmem>>, %arg5: memref<1x32xf32, #tpu.memory_space<vmem>>, %arg6: memref<32x8xf32, #tpu.memory_space<vmem>>, %arg7: memref<8x32xf32, #tpu.memory_space<vmem>>, %arg8: memref<1x32xf32, #tpu.memory_space<vmem>>, %arg9: memref<1x32xf32, #tpu.memory_space<vmem>>, %arg10: memref<1x32x16xf32, #tpu.memory_space<vmem>>, %arg11: memref<16x32xf32, #tpu.memory_space<vmem>>, %arg12: memref<1x32xf32, #tpu.memory_space<vmem>>, %arg13: memref<1x32xf32, #tpu.memory_space<vmem>>) attributes {dimension_semantics = [#tpu.dimension_semantics<parallel>, #tpu.dimension_semantics<arbitrary>], iteration_bounds = array<i64: 2, 1>, scalar_prefetch = 0 : i64, scratch_operands = 3 : i64, tpu.core_type = #tpu.core_type<tc>, window_params = [{transform_indices = @transform_0, window_bounds = array<i64: 1, 16, 48>}, {pipeline_mode = #tpu.pipeline_mode<synchronous>, transform_indices = @transform_1, window_bounds = array<i64: 48, 16>}, {pipeline_mode = #tpu.pipeline_mode<synchronous>, transform_indices = @transform_2, window_bounds = array<i64: 16, 32>}, {pipeline_mode = #tpu.pipeline_mode<synchronous>, transform_indices = @transform_3, window_bounds = array<i64: 1, 32>}, {pipeline_mode = #tpu.pipeline_mode<synchronous>, transform_indices = @transform_4, window_bounds = array<i64: 32, 8>}, {pipeline_mode = #tpu.pipeline_mode<synchronous>, transform_indices = @transform_5, window_bounds = array<i64: 8, 32>}, {pipeline_mode = #tpu.pipeline_mode<synchronous>, transform_indices = @transform_6, window_bounds = array<i64: 1, 32>}, {pipeline_mode = #tpu.pipeline_mode<synchronous>, transform_indices = @transform_7, window_bounds = array<i64: 1, 32>}, {transform_indices = @transform_8, window_bounds = array<i64: 1, 32, 16>}]} {
    %c0_i32 = arith.constant 0 : i32
    %0 = arith.cmpi eq, %arg1, %c0_i32 : i32
    %1 = arith.extui %0 : i1 to i32
    %c0_i32_0 = arith.constant 0 : i32
    %2 = arith.cmpi ne, %1, %c0_i32_0 : i32
    scf.if %2 {
      %cst_23 = arith.constant 0.000000e+00 : f32
      %31 = vector.broadcast %cst_23 : f32 to vector<1x32xf32>
      %c0_24 = arith.constant 0 : index
      %c0_25 = arith.constant 0 : index
      %32 = vector.load %arg12[%c0_24, %c0_25] : memref<1x32xf32, #tpu.memory_space<vmem>>, vector<1x32xf32>
      tpu.vector_store %arg12[%c0_24, %c0_25], %31 {strides = array<i32>} : memref<1x32xf32, #tpu.memory_space<vmem>>, vector<1x32xf32>,
      %cst_26 = arith.constant 0.000000e+00 : f32
      %33 = vector.broadcast %cst_26 : f32 to vector<1x32xf32>
      %c0_27 = arith.constant 0 : index
      %c0_28 = arith.constant 0 : index
      %34 = vector.load %arg13[%c0_27, %c0_28] : memref<1x32xf32, #tpu.memory_space<vmem>>, vector<1x32xf32>
      tpu.vector_store %arg13[%c0_27, %c0_28], %33 {strides = array<i32>} : memref<1x32xf32, #tpu.memory_space<vmem>>, vector<1x32xf32>,
    } else {
    }
    %c0 = arith.constant 0 : index
    %c0_1 = arith.constant 0 : index
    %c0_2 = arith.constant 0 : index
    %3 = vector.load %arg2[%c0, %c0_1, %c0_2] : memref<1x16x48xbf16, #tpu.memory_space<vmem>>, vector<1x16x48xbf16>
    %4 = vector.shape_cast %3 : vector<1x16x48xbf16> to vector<16x48xbf16>
    %c0_3 = arith.constant 0 : index
    %c0_4 = arith.constant 0 : index
    %5 = vector.load %arg3[%c0_3, %c0_4] : memref<48x16xbf16, #tpu.memory_space<vmem>>, vector<48x16xbf16>
    %cst = arith.constant dense<0.000000e+00> : vector<16x16xf32>
    %6 = tpu.matmul %4, %5, %cst {dimension_numbers = #tpu.dot_dimension_numbers<[1], [0], [0], [1], [0, 0, 1, 1], [], []>} : vector<16x48xbf16>, vector<48x16xbf16>, vector<16x16xf32> -> vector<16x16xf32>
    %7 = arith.truncf %6 : vector<16x16xf32> to vector<16x16xbf16>
    %c0_5 = arith.constant 0 : index
    %c0_6 = arith.constant 0 : index
    %8 = vector.load %arg4[%c0_5, %c0_6] : memref<16x32xbf16, #tpu.memory_space<vmem>>, vector<16x32xbf16>
    %cst_7 = arith.constant dense<0.000000e+00> : vector<16x32xf32>
    %9 = tpu.matmul %7, %8, %cst_7 {dimension_numbers = #tpu.dot_dimension_numbers<[1], [0], [0], [1], [0, 0, 1, 1], [], []>} : vector<16x16xbf16>, vector<16x32xbf16>, vector<16x32xf32> -> vector<16x32xf32>
    %c0_8 = arith.constant 0 : index
    %c0_9 = arith.constant 0 : index
    %10 = vector.load %arg5[%c0_8, %c0_9] : memref<1x32xf32, #tpu.memory_space<vmem>>, vector<1x32xf32>
    %11 = vector.broadcast %10 : vector<1x32xf32> to vector<16x32xf32>
    %12 = arith.addf %9, %11 : vector<16x32xf32>
    %c16_i32 = arith.constant 16 : i32
    %13 = arith.muli %arg1, %c16_i32 : i32
    %14 = tpu.assume_multiple %13, 16 : i32
    %15 = arith.index_cast %14 : i32 to index
    %c0_10 = arith.constant 0 : index
    %16 = vector.load %arg11[%15, %c0_10] : memref<16x32xf32, #tpu.memory_space<vmem>>, vector<16x32xf32>
    tpu.vector_store %arg11[%15, %c0_10], %12 {strides = array<i32>} : memref<16x32xf32, #tpu.memory_space<vmem>>, vector<16x32xf32>,
    %c0_11 = arith.constant 0 : index
    %c0_12 = arith.constant 0 : index
    %17 = vector.load %arg12[%c0_11, %c0_12] : memref<1x32xf32, #tpu.memory_space<vmem>>, vector<1x32xf32>
    %cst_13 = arith.constant dense<0.000000e+00> : vector<32xf32>
    %18 = vector.multi_reduction <add>, %12, %cst_13 [0] : vector<16x32xf32> to vector<32xf32>
    %19 = vector.shape_cast %18 : vector<32xf32> to vector<1x32xf32>
    %20 = arith.addf %17, %19 : vector<1x32xf32>
    %c0_14 = arith.constant 0 : index
    %c0_15 = arith.constant 0 : index
    %21 = vector.load %arg12[%c0_14, %c0_15] : memref<1x32xf32, #tpu.memory_space<vmem>>, vector<1x32xf32>
    tpu.vector_store %arg12[%c0_14, %c0_15], %20 {strides = array<i32>} : memref<1x32xf32, #tpu.memory_space<vmem>>, vector<1x32xf32>,
    %c0_16 = arith.constant 0 : index
    %c0_17 = arith.constant 0 : index
    %22 = vector.load %arg13[%c0_16, %c0_17] : memref<1x32xf32, #tpu.memory_space<vmem>>, vector<1x32xf32>
    %23 = arith.mulf %12, %12 : vector<16x32xf32>
    %cst_18 = arith.constant dense<0.000000e+00> : vector<32xf32>
    %24 = vector.multi_reduction <add>, %23, %cst_18 [0] : vector<16x32xf32> to vector<32xf32>
    %25 = vector.shape_cast %24 : vector<32xf32> to vector<1x32xf32>
    %26 = arith.addf %22, %25 : vector<1x32xf32>
    %c0_19 = arith.constant 0 : index
    %c0_20 = arith.constant 0 : index
    %27 = vector.load %arg13[%c0_19, %c0_20] : memref<1x32xf32, #tpu.memory_space<vmem>>, vector<1x32xf32>
    tpu.vector_store %arg13[%c0_19, %c0_20], %26 {strides = array<i32>} : memref<1x32xf32, #tpu.memory_space<vmem>>, vector<1x32xf32>,
    %c0_i32_21 = arith.constant 0 : i32
    %28 = arith.cmpi eq, %arg1, %c0_i32_21 : i32
    %29 = arith.extui %28 : i1 to i32
    %c0_i32_22 = arith.constant 0 : i32
    %30 = arith.cmpi ne, %29, %c0_i32_22 : i32
    scf.if %30 {
      %c0_23 = arith.constant 0 : index
      %c0_24 = arith.constant 0 : index
      %31 = vector.load %arg12[%c0_23, %c0_24] : memref<1x32xf32, #tpu.memory_space<vmem>>, vector<1x32xf32>
      %c0_25 = arith.constant 0 : index
      %c0_26 = arith.constant 0 : index
      %32 = vector.load %arg13[%c0_25, %c0_26] : memref<1x32xf32, #tpu.memory_space<vmem>>, vector<1x32xf32>
      %33 = tpu.concatenate %31, %32 in 0 : vector<1x32xf32>, vector<1x32xf32> -> vector<2x32xf32>
      %c0_27 = arith.constant 0 : index
      %c0_28 = arith.constant 0 : index
      %34 = vector.load %arg6[%c0_27, %c0_28] : memref<32x8xf32, #tpu.memory_space<vmem>>, vector<32x8xf32>
      %cst_29 = arith.constant dense<0.000000e+00> : vector<2x8xf32>
      %35 = tpu.matmul %33, %34, %cst_29 {dimension_numbers = #tpu.dot_dimension_numbers<[1], [0], [0], [1], [0, 0, 1, 1], [], []>} : vector<2x32xf32>, vector<32x8xf32>, vector<2x8xf32> -> vector<2x8xf32>
      %c0_30 = arith.constant 0 : index
      %c0_31 = arith.constant 0 : index
      %36 = vector.load %arg7[%c0_30, %c0_31] : memref<8x32xf32, #tpu.memory_space<vmem>>, vector<8x32xf32>
      %cst_32 = arith.constant dense<0.000000e+00> : vector<2x32xf32>
      %37 = tpu.matmul %35, %36, %cst_32 {dimension_numbers = #tpu.dot_dimension_numbers<[1], [0], [0], [1], [0, 0, 1, 1], [], []>} : vector<2x8xf32>, vector<8x32xf32>, vector<2x32xf32> -> vector<2x32xf32>
      %38 = vector.extract_strided_slice %37 {offsets = [0, 0], sizes = [1, 32], strides = [1, 1]} : vector<2x32xf32> to vector<1x32xf32>
      %39 = vector.extract_strided_slice %37 {offsets = [1, 0], sizes = [1, 32], strides = [1, 1]} : vector<2x32xf32> to vector<1x32xf32>
      %40 = arith.mulf %38, %38 : vector<1x32xf32>
      %41 = arith.subf %39, %40 : vector<1x32xf32>
      %cst_33 = arith.constant 9.99999974E-6 : f32
      %42 = vector.broadcast %cst_33 : f32 to vector<1x32xf32>
      %43 = arith.addf %41, %42 : vector<1x32xf32>
      %44 = math.rsqrt %43 : vector<1x32xf32>
      %c0_34 = arith.constant 0 : index
      %c0_35 = arith.constant 0 : index
      %45 = vector.load %arg8[%c0_34, %c0_35] : memref<1x32xf32, #tpu.memory_space<vmem>>, vector<1x32xf32>
      %46 = arith.mulf %45, %44 : vector<1x32xf32>
      %c0_36 = arith.constant 0 : index
      %c0_37 = arith.constant 0 : index
      %47 = vector.load %arg9[%c0_36, %c0_37] : memref<1x32xf32, #tpu.memory_space<vmem>>, vector<1x32xf32>
      %48 = arith.mulf %38, %46 : vector<1x32xf32>
      %49 = arith.subf %47, %48 : vector<1x32xf32>
      %c0_38 = arith.constant 0 : index
      %c0_39 = arith.constant 0 : index
      %50 = vector.load %arg11[%c0_38, %c0_39] : memref<16x32xf32, #tpu.memory_space<vmem>>, vector<16x32xf32>
      %51 = vector.broadcast %46 : vector<1x32xf32> to vector<16x32xf32>
      %52 = arith.mulf %50, %51 : vector<16x32xf32>
      %53 = vector.broadcast %49 : vector<1x32xf32> to vector<16x32xf32>
      %54 = arith.addf %52, %53 : vector<16x32xf32>
      %55 = tpu.transpose %54, [1, 0] : vector<16x32xf32> -> vector<32x16xf32>
      %c0_40 = arith.constant 0 : index
      %c0_41 = arith.constant 0 : index
      %c0_42 = arith.constant 0 : index
      %56 = vector.load %arg10[%c0_40, %c0_41, %c0_42] : memref<1x32x16xf32, #tpu.memory_space<vmem>>, vector<1x32x16xf32>
      %57 = vector.shape_cast %56 : vector<1x32x16xf32> to vector<32x16xf32>
      %58 = vector.shape_cast %55 : vector<32x16xf32> to vector<1x32x16xf32>
      tpu.vector_store %arg10[%c0_40, %c0_41, %c0_42], %58 {strides = array<i32>} : memref<1x32x16xf32, #tpu.memory_space<vmem>>, vector<1x32x16xf32>,
    } else {
    }
    return
  }
  func.func @transform_0(%arg0: i32, %arg1: i32) -> (i32, i32, i32) {
    %c0_i32 = arith.constant 0 : i32
    %c0_i32_0 = arith.constant 0 : i32
    return %arg0, %arg1, %c0_i32 : i32, i32, i32
  }
  func.func @transform_1(%arg0: i32, %arg1: i32) -> (i32, i32) {
    %c0_i32 = arith.constant 0 : i32
    %c0_i32_0 = arith.constant 0 : i32
    %c0_i32_1 = arith.constant 0 : i32
    return %c0_i32, %c0_i32_0 : i32, i32
  }
  func.func @transform_2(%arg0: i32, %arg1: i32) -> (i32, i32) {
    %c0_i32 = arith.constant 0 : i32
    %c0_i32_0 = arith.constant 0 : i32
    %c0_i32_1 = arith.constant 0 : i32
    return %c0_i32, %c0_i32_0 : i32, i32
  }
  func.func @transform_3(%arg0: i32, %arg1: i32) -> (i32, i32) {
    %c0_i32 = arith.constant 0 : i32
    %c0_i32_0 = arith.constant 0 : i32
    %c0_i32_1 = arith.constant 0 : i32
    return %c0_i32, %c0_i32_0 : i32, i32
  }
  func.func @transform_4(%arg0: i32, %arg1: i32) -> (i32, i32) {
    %c0_i32 = arith.constant 0 : i32
    %c0_i32_0 = arith.constant 0 : i32
    %c0_i32_1 = arith.constant 0 : i32
    return %c0_i32, %c0_i32_0 : i32, i32
  }
  func.func @transform_5(%arg0: i32, %arg1: i32) -> (i32, i32) {
    %c0_i32 = arith.constant 0 : i32
    %c0_i32_0 = arith.constant 0 : i32
    %c0_i32_1 = arith.constant 0 : i32
    return %c0_i32, %c0_i32_0 : i32, i32
  }
  func.func @transform_6(%arg0: i32, %arg1: i32) -> (i32, i32) {
    %c0_i32 = arith.constant 0 : i32
    %c0_i32_0 = arith.constant 0 : i32
    %c0_i32_1 = arith.constant 0 : i32
    return %c0_i32, %c0_i32_0 : i32, i32
  }
  func.func @transform_7(%arg0: i32, %arg1: i32) -> (i32, i32) {
    %c0_i32 = arith.constant 0 : i32
    %c0_i32_0 = arith.constant 0 : i32
    %c0_i32_1 = arith.constant 0 : i32
    return %c0_i32, %c0_i32_0 : i32, i32
  }
  func.func @transform_8(%arg0: i32, %arg1: i32) -> (i32, i32, i32) {
    %c0_i32 = arith.constant 0 : i32
    %c0_i32_0 = arith.constant 0 : i32
    %c0_i32_1 = arith.constant 0 : i32
    return %arg0, %c0_i32, %c0_i32_0 : i32, i32, i32
  }
}

</mosaic_0001>

<bundles_post_ra>
// kernel: tpu_custom_call.1
= control target key start
LH: loop header
LB: loop body
LE: loop exit
PB: predicated region body
PF: predicated region fallthrough
CT: control target
= control target key end

     0   :  { %s1005_s27 = smov 0   ;;  %s1007_s28 = smov 0   ;;  %s1113_s0 = inlined_call_operand.vmem [shape: bf16[2,16,48], index: 0, kind: input, shape index: {}]   ;;  %s1114_s1 = inlined_call_operand.vmem [shape: bf16[48,16], index: 1, kind: input, shape index: {}]   ;;  %s1115_s2 = inlined_call_operand.vmem [shape: bf16[16,32], index: 2, kind: input, shape index: {}]   ;;  %s1116_s3 = inlined_call_operand.vmem [shape: f32[1,32], index: 3, kind: input, shape index: {}]   ;;  %s1117_s4 = inlined_call_operand.vmem [shape: f32[32,8], index: 4, kind: input, shape index: {}]   ;;  %s1118_s5 = inlined_call_operand.vmem [shape: f32[8,32], index: 5, kind: input, shape index: {}]   ;;  %s1119_s6 = inlined_call_operand.vmem [shape: f32[1,32], index: 6, kind: input, shape index: {}]   ;;  %s1120_s7 = inlined_call_operand.vmem [shape: f32[1,32], index: 7, kind: input, shape index: {}]   ;;  %s1121_s8 = inlined_call_operand.vmem [shape: f32[2,32,16], index: 8, kind: output, shape index: {}]  }
   0x1   :  { %s1009_s29 = smov 0  }
   0x2 LB: > { %s30_s30 = sadd.s32 1, %s951_s28  ;;  %p834_p0 = scmp.ge.s32.totalorder %s955_s29, 1  ;;  %s955_s29 = sphi %s1009_s29, %s18_s29   ;;  %s951_s28 = sphi %s1007_s28, %s1123_s28   ;;  %s947_s27 = sphi %s1005_s27, %s1122_s27  }
   0x3   : > { %p32_p1 = scmp.ge.s32.totalorder %s30_s30, 2  ;;  %p281_p2 = scmp.lt.s32.totalorder %s955_s29, 3 }
   0x5   : > { %s1125_s30 = smov (%p32_p1, %s30_s30), 0  ;;  %p282_p3 = pnand %p834_p0, %p281_p2 }
   0x6   : > { %p320_p4 = scmp.lt.s32.totalorder (!%p282_p3), %s947_s27, 1 }
   0x7   : > { %285 = sbr.rel (%p282_p3) target bundleno = 1013 (0x3f5), region = 52 }
   0xc   : > { %v926_v0 = vld [vmem:[%s1114_s1 + $0x10] sm:$0xff]   ;;  %v957_v1 = vmov 0.0   ;;  %v927_v2 = vld [vmem:[%s1114_s1 + $0x8] sm:$0xff]   ;;  %vm958_vm0 = vmmov 0   ;;  %s1127_s27 = smov (!%p320_p4, %s947_s27), 1  ;;  %v928_v3 = vld [vmem:[%s1114_s1] sm:$0xff]   ;;  %v688_v60 = vlaneseq }
   0xd   : > { %867 = vmatprep.subr.bf16.mxu0 %v957_v1  ;;  %877 = vmatprep.subr.bf16.mxu1 %v957_v1  ;;  %s852_s15 = sshll.u32 %s1127_s27, 3  ;;  %vm373_vm1 = vcmask 392192   ;;  %v930_v5 = vld [vmem:[%s1115_s2] sm:$0xff]   ;;  %vm434_vm2 = vcmask 130048   ;;  %vm339_vm3 = vcmask 253952   ;;  %v527_v11 = vld [vmem:[%s1117_s4 + $0x18] sm:$0xff] }
   0xe   : > { %868 = vmatpush3.bf16.msra.mxu0 %v926_v0  ;;  %873 = vmatprep.mubr.msk.bf16.mxu0 %vm958_vm0, %v957_v1  ;;  %s327_s18 = scalar_lea.vmem %s1113_s0, %s852_s15  ;;  %340 = vst.msk [vmem:[#allocation3] sm:$0x1] %vm339_vm3, %v957_v1  ;;  %341 = vst.msk [vmem:[#allocation4] sm:$0x1] %vm339_vm3, %v957_v1  ;;  %v526_v12 = vld [vmem:[%s1117_s4 + $0x10] sm:$0xff]  ;;  %v525_v13 = vld [vmem:[%s1117_s4 + $0x8] sm:$0xff] }
   0xf   : > { %869 = vmatprep.subr.bf16.mxu0 %v957_v1  ;;  %879 = vmatprep.mubr.msk.bf16.mxu1 %vm958_vm0, %v957_v1  ;;  %v929_v4 = vld [vmem:[%s327_s18] sm:$0xff]   ;;  %vm481_vm4 = vcmask 261120   ;;  %vm522_vm5 = vcmask 1040384   ;;  %vm602_vm6 = vcmask 64512   ;;  %v959_v58 = vmov 1966171168  }
  0x10   : > { %878 = vmatpush3.bf16.msra.mxu1 %v930_v5  ;;  %v524_v14 = vld [vmem:[%s1117_s4] sm:$0xff]  ;;  %v686_v59 = vunpack.c.l.s4 %v959_v58  ;;  %v689_v62 = vshrl.u32 %v688_v60, 7  ;;  %s853_s19 = sshll.u32 %s1127_s27, 5 }
  0x11   : > { %883 = vmatprep.subr.mxu1 %v957_v1  ;;  %v844_v15 = vld [vmem:[%s1116_s3] ss:$0 sm:$0xff]  ;;  %s333_s22 = scalar_lea.vmem %s1121_s8, %s853_s19 }
  0x12   : > { %870 = vmatpush3.bf16.msra.mxu0 %v927_v2  ;;  %v601_v48 = vld [vmem:[%s1118_s5] sm:$0xff]  ;;  %v687_v61 = vunpack.c.0.s8 %v686_v59  ;;  %v710_v5 = vsub.s32 0, %v689_v62 }
  0x13   : > { %871 = vmatprep.subr.bf16.mxu0 %v957_v1 }
  0x14   : > { %v690_v63 = vsub.s32 %v687_v61, %v689_v62 }
  0x15   : > { %v484_v39 = vld [vmem:[#allocation3] sm:$0x1]  ;;  %v497_v42 = vld [vmem:[#allocation4] sm:$0x1] }
  0x16   : > { %872 = vmatpush3.bf16.msra.mxu0 %v928_v3  ;;  %v683_v3 = vld [vmem:[%s1119_s6] sm:$0x1] }
  0x19   : > { %874 = vmatmul.mubr.msk.bf16.vlgmr.msra.gmra.mxu0 %vm373_vm1, %v929_v4 }
  0xd9   : > { %v411_v6 = vpop.f32.mrf.mxu0 }
  0xdb   : > { %v875_v7 = vpop.f32.mrf.mxu0 }
  0xdc   : > { %v702_v7 = vld [vmem:[%s1120_s7] sm:$0x1] }
  0xdd   : > { %v414_v8 = vpop.f32.mrf.mxu0 }
  0xde   : > { %v418_v9 = vpack.c.bf16 %v414_v8, %v411_v6 }
  0xdf   : > { %v876_v10 = vpop.f32.mrf.mxu0 }
  0xe0   : > { %880 = vmatmul.mubr.msk.bf16.vlgmr.msra.gmra.mxu1 %vm434_vm2, %v418_v9 }
  0xe1   : > { %891 = vmatprep.mubr.msk.f32.mxu1 %vm958_vm0, %v957_v1  ;;  %884 = vmatpush3.msra.mxu1 %v527_v11 }
  0xe2   : > { %885 = vmatprep.subr.mxu1 %v957_v1 }
  0xe3   : > { %886 = vmatpush3.msra.mxu1 %v526_v12 }
  0xe4   : > { %887 = vmatprep.subr.mxu1 %v957_v1 }
  0xe5   : > { %888 = vmatpush3.msra.mxu1 %v525_v13 }
  0xe6   : > { %889 = vmatprep.subr.mxu1 %v957_v1 }
  0xe7   : > { %890 = vmatpush3.msra.mxu1 %v524_v14 }
  0xe8   : > { %894 = vmatprep.subr.mxu1 %v957_v1 }
 0x1a0   : > { %v472_v16 = vpop.f32.mrf.mxu1 }
 0x1a1   : > { %v473_v17 = vadd.f32 %v844_v15, %v472_v16 }
 0x1a2   : > { %v881_v18 = vpop.f32.mrf.mxu1 }
 0x1a3   : > { %482 = vst.msk [vmem:[#allocation2] sm:$0xff] %vm481_vm4, %v473_v17  ;;  %v498_v20 = vmul.f32 %v473_v17, %v473_v17  ;;  %v485_v23 = vsel %vm481_vm4, %v473_v17, 0.0 }
 0x1a4   : > { %v475_v19 = vpop.f32.mrf.mxu1 }
 0x1a5   : > { %v476_v21 = vadd.f32 %v844_v15, %v475_v19  ;;  %v500_v27 = vsel %vm481_vm4, %v498_v20, 0.0 }
 0x1a6   : > { %v882_v22 = vpop.f32.mrf.mxu1 }
 0x1a7   : > { %483 = vst.msk [vmem:[#allocation2 + $0x8] sm:$0xff] %vm481_vm4, %v476_v21  ;;  %v486_v24 = vsel %vm481_vm4, %v476_v21, 0.0  ;;  %v499_v25 = vmul.f32 %v476_v21, %v476_v21 }
 0x1a8   : > { %v487_v26 = vadd.f32 %v486_v24, %v485_v23 }
 0x1a9   : > { %v501_v28 = vsel %vm481_vm4, %v499_v25, 0.0 }
 0x1aa   : > { %v488_v29 = vrot.slane %v487_v26, 4  ;;  %v502_v30 = vadd.f32 %v501_v28, %v500_v27  ;;  %v705_v11 = vld [vmem:[#allocation2] sm:$0xff] }
 0x1ac   : > { %v489_v31 = vadd.f32 %v488_v29, %v487_v26  ;;  %v503_v32 = vrot.slane %v502_v30, 4 }
 0x1ae   : > { %v490_v33 = vrot.slane %v489_v31, 2  ;;  %v504_v34 = vadd.f32 %v503_v32, %v502_v30  ;;  %v706_v15 = vld [vmem:[#allocation2 + $0x8] sm:$0xff] }
 0x1b0   : > { %v491_v35 = vadd.f32 %v490_v33, %v489_v31  ;;  %v505_v36 = vrot.slane %v504_v34, 2 }
 0x1b2   : > { %v492_v37 = vrot.slane %v491_v35, 1  ;;  %v506_v38 = vadd.f32 %v505_v36, %v504_v34 }
 0x1b4   : > { %v493_v40 = vadd.f32 %v492_v37, %v491_v35  ;;  %v507_v41 = vrot.slane %v506_v38, 1 }
 0x1b6   : > { %v494_v43 = vadd.f32 %v493_v40, %v484_v39  ;;  %v508_v44 = vadd.f32 %v507_v41, %v506_v38 }
 0x1b8   : > { %496 = vst.msk [vmem:[#allocation3] sm:$0x1] %vm339_vm3, %v494_v43  ;;  %v509_v45 = vadd.f32 %v508_v44, %v497_v42 }
 0x1ba   : > { %510 = vst.msk [vmem:[#allocation4] sm:$0x1] %vm339_vm3, %v509_v45 }
 0x1bf   : > { %v514_v46 = vld [vmem:[#allocation3] sm:$0x1] }
 0x1c1   : > { %v847_v47 = vld [vmem:[#allocation4] ss:$0 sm:$0xff] }
 0x1c2   : > { %v523_v49 = vsel %vm522_vm5, %v514_v46, %v847_v47 }
 0x1c3   : > { %892 = vmatmul.mubr.msk.f32.vlgmr.msra.gmra.mxu1 %vm481_vm4, %v523_v49 }
 0x1c4   : > { %895 = vmatpush3.msra.mxu1 %v601_v48  ;;  %896 = vmatprep.mubr.msk.f32.mxu1 %vm958_vm0, %v957_v1 }
 0x283   : > { %v597_v50 = vpop.f32.mrf.mxu1 }
 0x284   : > { %897 = vmatmul.mubr.msk.f32.vlgmr.msra.gmra.mxu1 %vm602_vm6, %v597_v50 }
 0x285   : > { %v893_v51 = vpop.f32.mrf.mxu1 }
 0x344   : > { %v672_v52 = vpop.f32.mrf.mxu1 }
 0x345   : > { %v676_v53 = vmul.f32 %v672_v52, %v672_v52 }
 0x346   : > { %v898_v54 = vpop.f32.mrf.mxu1 }
 0x347   : > { %v678_v55 = vrot.slane %v676_v53, 7 }
 0x349   : > { %v680_v56 = vsub.f32 %v672_v52, %v678_v55 }
 0x34b   : > { %v681_v57 = vadd.f32 1e-05, %v680_v56 }
 0x34d   : > { %931 = vrsqrt.f32 %v681_v57 }
 0x35a   : > { %v932_v0 = vpop.eup %931 }
 0x35b   : > { %v691_v2 = vrot.slane %v932_v0, %v690_v63 }
 0x35d   : > { %v692_v1 = vcombine.high %v691_v2, %v691_v2 }
 0x35f   : > { %v699_v4 = vrot.slane %v692_v1, %v690_v63 }
 0x361   : > { %v701_v6 = vmul.f32 %v699_v4, %v683_v3 }
 0x363   : > { %v703_v8 = vmul.f32 %v701_v6, %v672_v52  ;;  %v711_v9 = vrot.slane %v701_v6, %v710_v5 }
 0x365   : > { %v704_v10 = vsub.f32 %v702_v7, %v703_v8  ;;  %v713_v12 = vmul.f32 %v711_v9, %v705_v11  ;;  %v714_v16 = vmul.f32 %v711_v9, %v706_v15 }
 0x367   : > { %v719_v13 = vrot.slane %v704_v10, %v710_v5 }
 0x369   : > { %v721_v14 = vadd.f32 %v719_v13, %v713_v12  ;;  %v722_v17 = vadd.f32 %v719_v13, %v714_v16 }
 0x36b   : > { %723 = vxpose.xlu0.b32.start [1/2] (short) (narrow) %v721_v14, 32 }
 0x36f   : > { %724 = vxpose.xlu0.b32.end [2/2] (short) (narrow) %v722_v17, 32 }
 0x3e7   : > { %v739_v18 = vpop.trf.xlu0 }
 0x3e8   : > { %755 = vst.msk [vmem:[%s333_s22] sm:$0xff] %vm434_vm2, %v739_v18 }
 0x3eb   : > { %v740_v19 = vpop.trf.xlu0 }
 0x3ec   : > { %756 = vst.msk [vmem:[%s333_s22 + $0x8] sm:$0xff] %vm434_vm2, %v740_v19 }
 0x3ef   : > { %v741_v20 = vpop.trf.xlu0 }
 0x3f0   : > { %757 = vst.msk [vmem:[%s333_s22 + $0x10] sm:$0xff] %vm434_vm2, %v741_v20 }
 0x3f3   : > { %v742_v21 = vpop.trf.xlu0 }
 0x3f4   : > { %758 = vst.msk [vmem:[%s333_s22 + $0x18] sm:$0xff] %vm434_vm2, %v742_v21 }
 0x3f5 PF: > { %s18_s29 = sadd.s32 1, %s955_s29   ;;  %s1122_s27 = smov %s951_s28 }
 0x3f6   : > { %p15_p5 = scmp.ge.s32.totalorder %s18_s29, 4   ;;  %s1123_s28 = smov %s1125_s30 }
 0x3f8   :  { %17 = sbr.rel (!%p15_p5) target bundleno = 2 (0x2), region = 91 }

</bundles_post_ra>
